<compile_context>
chip_gen: v6e
topology: v6e:2x2x1
jax: 0.10.0
libtpu: 0.0.40
codegen_flags: <defaults>
</compile_context>

<pallas_src>
import jax
import jax.numpy as jnp
from jax.experimental import pallas as pl
from jax.experimental.pallas import tpu as pltpu

# ---- model hyper-parameters (small synthetic sizes) -------------------------
N_USERS = 8
N_ITEMS = 8
N_NODES = N_USERS + N_ITEMS        # 16
EMB_DIM = 32
NUM_LAYERS = 2
M_EXP = -0.5                       # out-degree (source) normalization exponent
N_EXP = -0.5                       # in-degree (destination) normalization exponent


def _deg_pow(deg: jnp.ndarray, exponent: float) -> jnp.ndarray:
    """deg**exponent with static fast paths (deg is clamped >= 1)."""
    if exponent == -0.5:
        return jax.lax.rsqrt(deg)          # single EUP op instead of log/mul/exp
    if exponent == 0.0:
        return jnp.ones_like(deg)
    if exponent == 1.0:
        return deg
    return deg ** exponent


# ---- Pallas kernel ----------------------------------------------------------
def tagcf_mp_kernel(a_t_ref, h_t_ref, ns_ref, nd_ref, out_ref):
    """Feature-collapsed TAG-CF propagation (single lane-dense block).

    a_t_ref : (Np, Np)  transposed adjacency, a_t[src, dst] = A[dst, src]
    h_t_ref : (Dp, Np)  transposed embeddings (feature dim on sublanes)
    ns_ref  : (1, Np)   out_deg ** m   (per-source normalization)
    nd_ref  : (1, Np)   in_deg ** n    (per-destination normalization)
    out_ref : (1, Np)   total_embedding = cat([h0..hL], 1).mean(1), lane dense
    """
    np_ = a_t_ref.shape[0]
    a_t = a_t_ref[...]                                       # (Np, Np)
    ns = ns_ref[...]                                         # (1, Np)
    nd = nd_ref[...]                                         # (1, Np)

    # The feature-axis mean readout only needs per-node row sums, and
    # rowsum(A_hat @ h) == A_hat @ rowsum(h), so propagate the node vector
    # instead of the (N, D) feature matrix.  Sublane-broadcast to 8 identical
    # rows so every matmul is a native (8, 128)-tiled MXU op.
    s = jnp.sum(h_t_ref[...], axis=0, keepdims=True)         # (1, Np) sublane reduce
    s8 = jnp.broadcast_to(s, (8, np_))                       # (8, Np)

    acc = s8                                                 # running sum over layers
    for _ in range(NUM_LAYERS):                              # static unroll
        # s_new[dst] = nd[dst] * sum_src A[dst,src] * ns[src] * s[src]
        s8 = jnp.dot(s8 * ns, a_t, preferred_element_type=jnp.float32) * nd
        acc = acc + s8

    # mean over the concatenated feature axis: (num_layers + 1) * D entries;
    # only row 0 is meaningful (rows are identical copies).
    out_ref[...] = acc[0:1, :] * (1.0 / ((NUM_LAYERS + 1) * EMB_DIM))


@jax.jit
def tagcf_total_embedding(adjacency: jnp.ndarray, emb_weight: jnp.ndarray) -> jnp.ndarray:
    """Returns total_embedding, shape (N,)."""
    n = adjacency.shape[0]
    d = emb_weight.shape[1]
    n_pad = ((n + 127) // 128) * 128          # nodes on the 128-lane axis
    d_pad = ((d + 7) // 8) * 8                # features on the 8-sublane axis

    # Degree normalizations (clamped >= 1, like torch .clamp(min=1)); tiny
    # (N,)-vector ops precomputed here so the kernel never reduces or
    # re-materializes the dense adjacency.
    out_deg = jnp.maximum(adjacency.sum(axis=0), 1.0)         # per source
    in_deg = jnp.maximum(adjacency.sum(axis=1), 1.0)          # per destination
    ns = _deg_pow(out_deg, M_EXP)
    nd = _deg_pow(in_deg, N_EXP)

    # Layout plumbing: pad to lane-dense tiles, transpose A and h so all kernel
    # vectors carry nodes on the lane axis.  Padded nodes have ns = nd = 0 and
    # zero features, so they contribute nothing and stay zero.
    a_t = jnp.zeros((n_pad, n_pad), jnp.float32).at[:n, :n].set(adjacency.T)
    h_t = jnp.zeros((d_pad, n_pad), jnp.float32).at[:d, :n].set(emb_weight.T)
    ns_p = jnp.zeros((1, n_pad), jnp.float32).at[0, :n].set(ns)
    nd_p = jnp.zeros((1, n_pad), jnp.float32).at[0, :n].set(nd)

    out = pl.pallas_call(
        tagcf_mp_kernel,
        out_shape=jax.ShapeDtypeStruct((1, n_pad), jnp.float32),
        grid=(1,),
        in_specs=[
            pl.BlockSpec((n_pad, n_pad), lambda i: (0, 0)),
            pl.BlockSpec((d_pad, n_pad), lambda i: (0, 0)),
            pl.BlockSpec((1, n_pad), lambda i: (0, 0)),
            pl.BlockSpec((1, n_pad), lambda i: (0, 0)),
        ],
        out_specs=pl.BlockSpec((1, n_pad), lambda i: (0, 0)),
        compiler_params=pltpu.CompilerParams(
            dimension_semantics=("arbitrary",)),
    )(a_t, h_t, ns_p, nd_p)
    return out[0, :n]


def tagcf_forward(adjacency, emb_weight, user_ids=None,
                  positive_item_ids=None, negative_item_ids=None):
    """TAGCF.forward (inference only): message passing + index gathers (glue)."""
    total = tagcf_total_embedding(adjacency, emb_weight)      # (N,)
    user_e = total[user_ids] if user_ids is not None else None
    pos_e = total[positive_item_ids] if positive_item_ids is not None else None
    neg_e = total[negative_item_ids] if negative_item_ids is not None else None
    return user_e, pos_e, neg_e


# ---- pure-JAX reference (for a quick correctness check) ---------------------
def reference_total_embedding(a, h):
    out_deg = jnp.maximum(a.sum(0), 1.0)
    in_deg = jnp.maximum(a.sum(1), 1.0)
    ns = out_deg ** M_EXP
    nd = in_deg ** N_EXP
    results = [h]
    x = h
    for _ in range(NUM_LAYERS):
        x = ((a * ns[None, :]) @ x) * nd[:, None]
        results.append(x)
    return jnp.concatenate(results, axis=1).mean(axis=1)


if __name__ == "__main__":
    key = jax.random.PRNGKey(0)

    # deterministic embedding table init (mirrors uniform_(-0.05, 0.05);
    # TAGCF would load a checkpoint -- synthetic init here, no file I/O)
    emb_weight = jax.random.uniform(
        key, (N_NODES, EMB_DIM), minval=-0.05, maxval=0.05, dtype=jnp.float32)

    # deterministic bipartite user-item graph, undirected (both edge directions)
    users = jnp.arange(N_USERS)
    adjacency = jnp.zeros((N_NODES, N_NODES), jnp.float32)
    for k in range(3):  # each user connects to 3 items
        items = (users * 3 + k) % N_ITEMS + N_USERS
        adjacency = adjacency.at[items, users].set(1.0)   # user -> item
        adjacency = adjacency.at[users, items].set(1.0)   # item -> user

    user_ids = jnp.array([0, 3], dtype=jnp.int32)
    pos_ids = jnp.array([N_USERS + 1, N_USERS + 5], dtype=jnp.int32)
    neg_ids = jnp.array([N_USERS + 2, N_USERS + 7], dtype=jnp.int32)

    user_e, pos_e, neg_e = tagcf_forward(
        adjacency, emb_weight, user_ids, pos_ids, neg_ids)
    jax.block_until_ready((user_e, pos_e, neg_e))

    # correctness check against pure-JAX reference
    total_kernel = tagcf_total_embedding(adjacency, emb_weight)
    total_ref = reference_total_embedding(adjacency, emb_weight)
    jax.block_until_ready((total_kernel, total_ref))
    assert jnp.allclose(total_kernel, total_ref, atol=1e-5, rtol=1e-5), (
        total_kernel, total_ref)

    print("KERNEL_OK")
</pallas_src>

<mosaic_0001>
module attributes {stable_mosaic.version = 11 : i64} {
  func.func @tagcf_mp_kernel(%arg0: i32, %arg1: memref<128x128xf32, #tpu.memory_space<vmem>>, %arg2: memref<32x128xf32, #tpu.memory_space<vmem>>, %arg3: memref<1x128xf32, #tpu.memory_space<vmem>>, %arg4: memref<1x128xf32, #tpu.memory_space<vmem>>, %arg5: memref<1x128xf32, #tpu.memory_space<vmem>>) attributes {dimension_semantics = [#tpu.dimension_semantics<arbitrary>], iteration_bounds = array<i64: 1>, scalar_prefetch = 0 : i64, scratch_operands = 0 : i64, tpu.core_type = #tpu.core_type<tc>, window_params = [{pipeline_mode = #tpu.pipeline_mode<synchronous>, transform_indices = @transform_0, window_bounds = array<i64: 128, 128>}, {pipeline_mode = #tpu.pipeline_mode<synchronous>, transform_indices = @transform_1, window_bounds = array<i64: 32, 128>}, {pipeline_mode = #tpu.pipeline_mode<synchronous>, transform_indices = @transform_2, window_bounds = array<i64: 1, 128>}, {pipeline_mode = #tpu.pipeline_mode<synchronous>, transform_indices = @transform_3, window_bounds = array<i64: 1, 128>}, {pipeline_mode = #tpu.pipeline_mode<synchronous>, transform_indices = @transform_4, window_bounds = array<i64: 1, 128>}]} {
    %c0 = arith.constant 0 : index
    %c0_0 = arith.constant 0 : index
    %0 = vector.load %arg1[%c0, %c0_0] : memref<128x128xf32, #tpu.memory_space<vmem>>, vector<128x128xf32>
    %c0_1 = arith.constant 0 : index
    %c0_2 = arith.constant 0 : index
    %1 = vector.load %arg3[%c0_1, %c0_2] : memref<1x128xf32, #tpu.memory_space<vmem>>, vector<1x128xf32>
    %c0_3 = arith.constant 0 : index
    %c0_4 = arith.constant 0 : index
    %2 = vector.load %arg4[%c0_3, %c0_4] : memref<1x128xf32, #tpu.memory_space<vmem>>, vector<1x128xf32>
    %c0_5 = arith.constant 0 : index
    %c0_6 = arith.constant 0 : index
    %3 = vector.load %arg2[%c0_5, %c0_6] : memref<32x128xf32, #tpu.memory_space<vmem>>, vector<32x128xf32>
    %cst = arith.constant dense<0.000000e+00> : vector<128xf32>
    %4 = vector.multi_reduction <add>, %3, %cst [0] : vector<32x128xf32> to vector<128xf32>
    %5 = vector.shape_cast %4 : vector<128xf32> to vector<1x128xf32>
    %6 = vector.shape_cast %5 : vector<1x128xf32> to vector<1x128xf32>
    %7 = vector.broadcast %6 : vector<1x128xf32> to vector<8x128xf32>
    %8 = vector.broadcast %1 : vector<1x128xf32> to vector<8x128xf32>
    %9 = arith.mulf %7, %8 : vector<8x128xf32>
    %cst_7 = arith.constant dense<0.000000e+00> : vector<8x128xf32>
    %10 = tpu.matmul %9, %0, %cst_7 {dimension_numbers = #tpu.dot_dimension_numbers<[1], [0], [0], [1], [0, 0, 1, 1], [], []>} : vector<8x128xf32>, vector<128x128xf32>, vector<8x128xf32> -> vector<8x128xf32>
    %11 = vector.broadcast %2 : vector<1x128xf32> to vector<8x128xf32>
    %12 = arith.mulf %10, %11 : vector<8x128xf32>
    %13 = arith.addf %7, %12 : vector<8x128xf32>
    %14 = vector.broadcast %1 : vector<1x128xf32> to vector<8x128xf32>
    %15 = arith.mulf %12, %14 : vector<8x128xf32>
    %cst_8 = arith.constant dense<0.000000e+00> : vector<8x128xf32>
    %16 = tpu.matmul %15, %0, %cst_8 {dimension_numbers = #tpu.dot_dimension_numbers<[1], [0], [0], [1], [0, 0, 1, 1], [], []>} : vector<8x128xf32>, vector<128x128xf32>, vector<8x128xf32> -> vector<8x128xf32>
    %17 = vector.broadcast %2 : vector<1x128xf32> to vector<8x128xf32>
    %18 = arith.mulf %16, %17 : vector<8x128xf32>
    %19 = arith.addf %13, %18 : vector<8x128xf32>
    %20 = vector.extract_strided_slice %19 {offsets = [0, 0], sizes = [1, 128], strides = [1, 1]} : vector<8x128xf32> to vector<1x128xf32>
    %cst_9 = arith.constant 0.010416667 : f32
    %21 = vector.broadcast %cst_9 : f32 to vector<1x128xf32>
    %22 = arith.mulf %20, %21 : vector<1x128xf32>
    %c0_10 = arith.constant 0 : index
    %c0_11 = arith.constant 0 : index
    %23 = vector.load %arg5[%c0_10, %c0_11] : memref<1x128xf32, #tpu.memory_space<vmem>>, vector<1x128xf32>
    tpu.vector_store %arg5[%c0_10, %c0_11], %22 {strides = array<i32>} : memref<1x128xf32, #tpu.memory_space<vmem>>, vector<1x128xf32>,
    return
  }
  func.func @transform_0(%arg0: i32) -> (i32, i32) {
    %c0_i32 = arith.constant 0 : i32
    %c0_i32_0 = arith.constant 0 : i32
    %c0_i32_1 = arith.constant 0 : i32
    return %c0_i32, %c0_i32_0 : i32, i32
  }
  func.func @transform_1(%arg0: i32) -> (i32, i32) {
    %c0_i32 = arith.constant 0 : i32
    %c0_i32_0 = arith.constant 0 : i32
    %c0_i32_1 = arith.constant 0 : i32
    return %c0_i32, %c0_i32_0 : i32, i32
  }
  func.func @transform_2(%arg0: i32) -> (i32, i32) {
    %c0_i32 = arith.constant 0 : i32
    %c0_i32_0 = arith.constant 0 : i32
    %c0_i32_1 = arith.constant 0 : i32
    return %c0_i32, %c0_i32_0 : i32, i32
  }
  func.func @transform_3(%arg0: i32) -> (i32, i32) {
    %c0_i32 = arith.constant 0 : i32
    %c0_i32_0 = arith.constant 0 : i32
    %c0_i32_1 = arith.constant 0 : i32
    return %c0_i32, %c0_i32_0 : i32, i32
  }
  func.func @transform_4(%arg0: i32) -> (i32, i32) {
    %c0_i32 = arith.constant 0 : i32
    %c0_i32_0 = arith.constant 0 : i32
    %c0_i32_1 = arith.constant 0 : i32
    return %c0_i32, %c0_i32_0 : i32, i32
  }
}

</mosaic_0001>

<bundles_post_ra>
// kernel: tagcf_total_embedding.1
= control target key start
LH: loop header
LB: loop body
LE: loop exit
PB: predicated region body
PF: predicated region fallthrough
CT: control target
= control target key end

     0   :  { %v320_v0 = vmov 0.0   ;;  %vm321_vm0 = vmmov 0   ;;  %s452_s0 = inlined_call_operand.vmem [shape: f32[128,128], index: 0, kind: input, shape index: {}]   ;;  %s453_s1 = inlined_call_operand.vmem [shape: f32[32,128], index: 1, kind: input, shape index: {}]   ;;  %s454_s2 = inlined_call_operand.vmem [shape: f32[1,128], index: 2, kind: input, shape index: {}]   ;;  %s455_s3 = inlined_call_operand.vmem [shape: f32[1,128], index: 3, kind: input, shape index: {}]   ;;  %s456_s4 = inlined_call_operand.vmem [shape: f32[1,128], index: 4, kind: output, shape index: {}]  }
   0x1   :  { %248 = vmatprep.subr.mxu0 %v320_v0  ;;  %v32_v1 = vld [vmem:[%s452_s0 + $0x78] sm:$0xff]  ;;  %v31_v2 = vld [vmem:[%s452_s0 + $0x70] sm:$0xff]  ;;  %280 = vmatprep.mubr.msk.f32.mxu0 %vm321_vm0, %v320_v0  ;;  %v30_v3 = vld [vmem:[%s452_s0 + $0x68] sm:$0xff] }
   0x2   :  { %249 = vmatpush3.msra.mxu0 %v32_v1  ;;  %283 = vmatprep.subr.mxu1 %v320_v0  ;;  %v29_v4 = vld [vmem:[%s452_s0 + $0x60] sm:$0xff]  ;;  %v28_v6 = vld [vmem:[%s452_s0 + $0x58] sm:$0xff]  ;;  %v36_v7 = vld [vmem:[%s453_s1 + $0x8] sm:$0xff] }
   0x3   :  { %250 = vmatprep.subr.mxu0 %v320_v0  ;;  %284 = vmatpush3.msra.mxu1 %v32_v1  ;;  %v35_v5 = vld [vmem:[%s453_s1] sm:$0xff]  ;;  %v37_v8 = vld [vmem:[%s453_s1 + $0x10] sm:$0xff]  ;;  %v38_v11 = vld [vmem:[%s453_s1 + $0x18] sm:$0xff] }
   0x4   :  { %251 = vmatpush3.msra.mxu0 %v31_v2  ;;  %285 = vmatprep.subr.mxu1 %v320_v0  ;;  %v39_v9 = vadd.f32 %v36_v7, %v35_v5  ;;  %v27_v10 = vld [vmem:[%s452_s0 + $0x50] sm:$0xff]  ;;  %v26_v13 = vld [vmem:[%s452_s0 + $0x48] sm:$0xff]  ;;  %v25_v15 = vld [vmem:[%s452_s0 + $0x40] sm:$0xff] }
   0x5   :  { %252 = vmatprep.subr.mxu0 %v320_v0  ;;  %286 = vmatpush3.msra.mxu1 %v31_v2  ;;  %v24_v17 = vld [vmem:[%s452_s0 + $0x38] sm:$0xff]  ;;  %v23_v19 = vld [vmem:[%s452_s0 + $0x30] sm:$0xff]  ;;  %v22_v21 = vld [vmem:[%s452_s0 + $0x28] sm:$0xff] }
   0x6   :  { %253 = vmatpush3.msra.mxu0 %v30_v3  ;;  %287 = vmatprep.subr.mxu1 %v320_v0  ;;  %v40_v12 = vadd.f32 %v39_v9, %v37_v8  ;;  %v21_v23 = vld [vmem:[%s452_s0 + $0x20] sm:$0xff]  ;;  %v20_v25 = vld [vmem:[%s452_s0 + $0x18] sm:$0xff]  ;;  %v19_v26 = vld [vmem:[%s452_s0 + $0x10] sm:$0xff] }
   0x7   :  { %254 = vmatprep.subr.mxu0 %v320_v0  ;;  %288 = vmatpush3.msra.mxu1 %v30_v3  ;;  %v212_v28 = vld [vmem:[%s454_s2] ss:$0 sm:$0xff]  ;;  %v18_v29 = vld [vmem:[%s452_s0 + $0x8] sm:$0xff] }
   0x8   :  { %255 = vmatpush3.msra.mxu0 %v29_v4  ;;  %289 = vmatprep.subr.mxu1 %v320_v0  ;;  %v41_v14 = vadd.f32 %v40_v12, %v38_v11  ;;  %v17_v30 = vld [vmem:[%s452_s0] sm:$0xff] }
   0x9   :  { %256 = vmatprep.subr.mxu0 %v320_v0  ;;  %290 = vmatpush3.msra.mxu1 %v29_v4  ;;  %v213_v32 = vld [vmem:[%s455_s3] ss:$0 sm:$0xff] }
   0xa   :  { %257 = vmatpush3.msra.mxu0 %v28_v6  ;;  %291 = vmatprep.subr.mxu1 %v320_v0  ;;  %v42_v16 = vrot.slane %v41_v14, 4 }
   0xb   :  { %258 = vmatprep.subr.mxu0 %v320_v0  ;;  %292 = vmatpush3.msra.mxu1 %v28_v6 }
   0xc   :  { %259 = vmatpush3.msra.mxu0 %v27_v10  ;;  %293 = vmatprep.subr.mxu1 %v320_v0  ;;  %v43_v18 = vadd.f32 %v42_v16, %v41_v14 }
   0xd   :  { %260 = vmatprep.subr.mxu0 %v320_v0  ;;  %294 = vmatpush3.msra.mxu1 %v27_v10 }
   0xe   :  { %261 = vmatpush3.msra.mxu0 %v26_v13  ;;  %295 = vmatprep.subr.mxu1 %v320_v0  ;;  %v44_v20 = vrot.slane %v43_v18, 2 }
   0xf   :  { %262 = vmatprep.subr.mxu0 %v320_v0  ;;  %296 = vmatpush3.msra.mxu1 %v26_v13 }
  0x10   :  { %263 = vmatpush3.msra.mxu0 %v25_v15  ;;  %297 = vmatprep.subr.mxu1 %v320_v0  ;;  %v45_v22 = vadd.f32 %v44_v20, %v43_v18 }
  0x11   :  { %264 = vmatprep.subr.mxu0 %v320_v0  ;;  %298 = vmatpush3.msra.mxu1 %v25_v15 }
  0x12   :  { %265 = vmatpush3.msra.mxu0 %v24_v17  ;;  %299 = vmatprep.subr.mxu1 %v320_v0  ;;  %v46_v24 = vrot.slane %v45_v22, 1 }
  0x13   :  { %266 = vmatprep.subr.mxu0 %v320_v0  ;;  %300 = vmatpush3.msra.mxu1 %v24_v17 }
  0x14   :  { %267 = vmatpush3.msra.mxu0 %v23_v19  ;;  %301 = vmatprep.subr.mxu1 %v320_v0  ;;  %v47_v27 = vadd.f32 %v46_v24, %v45_v22 }
  0x15   :  { %268 = vmatprep.subr.mxu0 %v320_v0  ;;  %302 = vmatpush3.msra.mxu1 %v23_v19 }
  0x16   :  { %269 = vmatpush3.msra.mxu0 %v22_v21  ;;  %303 = vmatprep.subr.mxu1 %v320_v0  ;;  %v54_v31 = vmul.f32 %v212_v28, %v47_v27 }
  0x17   :  { %270 = vmatprep.subr.mxu0 %v320_v0  ;;  %304 = vmatpush3.msra.mxu1 %v22_v21 }
  0x18   :  { %271 = vmatpush3.msra.mxu0 %v21_v23  ;;  %305 = vmatprep.subr.mxu1 %v320_v0 }
  0x19   :  { %272 = vmatprep.subr.mxu0 %v320_v0  ;;  %306 = vmatpush3.msra.mxu1 %v21_v23 }
  0x1a   :  { %273 = vmatpush3.msra.mxu0 %v20_v25  ;;  %307 = vmatprep.subr.mxu1 %v320_v0 }
  0x1b   :  { %274 = vmatprep.subr.mxu0 %v320_v0  ;;  %308 = vmatpush3.msra.mxu1 %v20_v25 }
  0x1c   :  { %275 = vmatpush3.msra.mxu0 %v19_v26  ;;  %309 = vmatprep.subr.mxu1 %v320_v0 }
  0x1d   :  { %276 = vmatprep.subr.mxu0 %v320_v0  ;;  %310 = vmatpush3.msra.mxu1 %v19_v26 }
  0x1e   :  { %277 = vmatpush3.msra.mxu0 %v18_v29  ;;  %311 = vmatprep.subr.mxu1 %v320_v0 }
  0x1f   :  { %278 = vmatprep.subr.mxu0 %v320_v0  ;;  %312 = vmatpush3.msra.mxu1 %v18_v29 }
  0x20   :  { %279 = vmatpush3.msra.mxu0 %v17_v30  ;;  %313 = vmatprep.subr.mxu1 %v320_v0 }
  0x21   :  { %281 = vmatmul.mubr.f32.vlgmr.msra.gmra.mxu0 %v54_v31  ;;  %314 = vmatpush3.msra.mxu1 %v17_v30 }
  0x22   :  { %315 = vmatprep.mubr.msk.f32.mxu1 %vm321_vm0, %v320_v0 }
  0xe1   :  { %v121_v33 = vpop.f32.mrf.mxu0 }
  0xe2   :  { %v131_v34 = vmul.f32 %v213_v32, %v121_v33 }
  0xe3   :  { %v282_v35 = vpop.f32.mrf.mxu0 }
  0xe4   :  { %v133_v36 = vmul.f32 %v212_v28, %v131_v34  ;;  %v132_v38 = vadd.f32 %v131_v34, %v47_v27 }
  0xe6   :  { %316 = vmatmul.mubr.f32.vlgmr.msra.gmra.mxu1 %v133_v36 }
 0x1a6   :  { %v200_v37 = vpop.f32.mrf.mxu1 }
 0x1a7   :  { %v204_v39 = vmul.f32 %v213_v32, %v200_v37 }
 0x1a8   :  { %v317_v40 = vpop.f32.mrf.mxu1 }
 0x1a9   :  { %v205_v41 = vadd.f32 %v204_v39, %v132_v38 }
 0x1ab   :  { %v206_v42 = vmul.f32 0.010416667, %v205_v41 }
 0x1ad   :  { %207 = vst [vmem:[%s456_s4] sm:$0x1] %v206_v42 }

</bundles_post_ra>
